<compile_context>
chip_gen: v7x
topology: tpu7x:2x2x1
jax: 0.10.0
libtpu: 0.0.40
codegen_flags: <defaults>
</compile_context>

<pallas_src>
import jax
import jax.numpy as jnp
from jax.experimental import pallas as pl
from jax.experimental.pallas import tpu as pltpu

KSIZE = 3
EPS = 1e-5                      # nn.BatchNorm3d default eps
TM = 512                        # M-tile (lane dim), multiple of 128
_VMEM_LIMIT = 32 * 1024 * 1024  # explicit scoped-VMEM limit (fits v5e/v6e/v7x)


def _round_up(x, m):
    return (x + m - 1) // m * m


# ----------------------------- Pallas kernels --------------------------------


def _conv_stats_kernel(xcol_ref, w_ref, y_ref, sum_ref, sumsq_ref):
    """One M-tile of conv (single folded-K matmul) + per-tile BN partial stats.

    xcol_ref : (Kp, TM)   bf16   im2col taps, channel-major, tap-major rows
    w_ref    : (Cout, Kp) bf16   folded weights (resident across the grid)
    y_ref    : (Cout, TM) f32    conv output tile (lane-dense)
    sum_ref  : (1, Cout, 1) f32  per-tile per-channel sum
    sumsq_ref: (1, Cout, 1) f32  per-tile per-channel sum of squares
    """
    y = jnp.dot(w_ref[...], xcol_ref[...], preferred_element_type=jnp.float32)
    y_ref[...] = y
    sum_ref[0] = jnp.sum(y, axis=1, keepdims=True)
    sumsq_ref[0] = jnp.sum(y * y, axis=1, keepdims=True)


def _affine_relu_kernel(y_ref, scale_ref, shift_ref, o_ref):
    """out = relu(y * scale + shift)  (BN folded into a per-channel affine)."""
    y = y_ref[...] * scale_ref[...] + shift_ref[...]
    o_ref[...] = jnp.maximum(y, 0.0).astype(o_ref.dtype)


def _affine_add_relu_kernel(y_ref, scale_ref, shift_ref, res_ref, o_ref):
    """out = relu(y * scale + shift + residual)."""
    y = y_ref[...] * scale_ref[...] + shift_ref[...] + res_ref[...]
    o_ref[...] = jnp.maximum(y, 0.0).astype(o_ref.dtype)


# --------------------------- pallas_call wrappers -----------------------------


def _compiler_params():
    return pltpu.CompilerParams(
        dimension_semantics=("parallel",),
        vmem_limit_bytes=_VMEM_LIMIT,
    )


def _conv_stats(xcolT, wT, tm):
    """xcolT: (Kp, Mp) bf16, wT: (Cout, Kp) bf16 -> (yT f32, psum, psumsq)."""
    Kp, Mp = xcolT.shape
    Cout = wT.shape[0]
    nt = Mp // tm
    return pl.pallas_call(
        _conv_stats_kernel,
        out_shape=(
            jax.ShapeDtypeStruct((Cout, Mp), jnp.float32),
            jax.ShapeDtypeStruct((nt, Cout, 1), jnp.float32),
            jax.ShapeDtypeStruct((nt, Cout, 1), jnp.float32),
        ),
        grid=(nt,),
        in_specs=[
            pl.BlockSpec((Kp, tm), lambda j: (0, j)),
            pl.BlockSpec((Cout, Kp), lambda j: (0, 0)),
        ],
        out_specs=[
            pl.BlockSpec((Cout, tm), lambda j: (0, j)),
            pl.BlockSpec((1, Cout, 1), lambda j: (j, 0, 0)),
            pl.BlockSpec((1, Cout, 1), lambda j: (j, 0, 0)),
        ],
        compiler_params=_compiler_params(),
    )(xcolT, wT)


def _affine_relu(yT, scale, shift, tm, out_dtype):
    Cout, Mp = yT.shape
    nt = Mp // tm
    return pl.pallas_call(
        _affine_relu_kernel,
        out_shape=jax.ShapeDtypeStruct((Cout, Mp), out_dtype),
        grid=(nt,),
        in_specs=[
            pl.BlockSpec((Cout, tm), lambda j: (0, j)),
            pl.BlockSpec((Cout, 1), lambda j: (0, 0)),
            pl.BlockSpec((Cout, 1), lambda j: (0, 0)),
        ],
        out_specs=pl.BlockSpec((Cout, tm), lambda j: (0, j)),
        compiler_params=_compiler_params(),
    )(yT, scale, shift)


def _affine_add_relu(yT, scale, shift, resT, tm):
    Cout, Mp = yT.shape
    nt = Mp // tm
    return pl.pallas_call(
        _affine_add_relu_kernel,
        out_shape=jax.ShapeDtypeStruct((Cout, Mp), jnp.float32),
        grid=(nt,),
        in_specs=[
            pl.BlockSpec((Cout, tm), lambda j: (0, j)),
            pl.BlockSpec((Cout, 1), lambda j: (0, 0)),
            pl.BlockSpec((Cout, 1), lambda j: (0, 0)),
            pl.BlockSpec((Cout, tm), lambda j: (0, j)),
        ],
        out_specs=pl.BlockSpec((Cout, tm), lambda j: (0, j)),
        compiler_params=_compiler_params(),
    )(yT, scale, shift, resT)


# ------------------------------- XLA glue -------------------------------------


def _im2col_T(x_cm, k_pad, m_pad):
    """Channel-major im2col: (C, N, D, H, W) -> (k_pad, m_pad) bf16.

    Row index = tap*C + c with tap = (kd*3+kh)*3+kw; column = ((n*D+d)*H+h)*W+w.
    Zero-padded rows/columns contribute 0 to the conv and to the BN sums.
    """
    C, N, D, H, W = x_cm.shape
    xp = jnp.pad(x_cm, ((0, 0), (0, 0), (1, 1), (1, 1), (1, 1)))
    taps = [
        xp[:, :, kd:kd + D, kh:kh + H, kw:kw + W].reshape(C, -1)
        for kd in range(KSIZE) for kh in range(KSIZE) for kw in range(KSIZE)
    ]
    xc = jnp.concatenate(taps, axis=0)                       # (27*C, M)
    xc = jnp.pad(xc, ((0, k_pad - xc.shape[0]), (0, m_pad - xc.shape[1])))
    return xc.astype(jnp.bfloat16)


def _fold_weight_T(w, k_pad):
    """PyTorch Conv3d weight (Cout, Cin, kD, kH, kW) -> (Cout, k_pad) bf16."""
    Cout, Cin = w.shape[0], w.shape[1]
    wt = jnp.transpose(w, (0, 2, 3, 4, 1)).reshape(Cout, KSIZE ** 3 * Cin)
    wt = jnp.pad(wt, ((0, 0), (0, k_pad - wt.shape[1])))
    return wt.astype(jnp.bfloat16)


def _bn_affine(psum, psumsq, gamma, beta, count):
    """Per-tile partials -> per-channel (scale, shift) for training-mode BN.

    Conv bias cancels: BN subtracts the batch mean, which absorbs any constant.
    """
    s = jnp.sum(psum, axis=0)                    # (Cout, 1)
    ss = jnp.sum(psumsq, axis=0)                 # (Cout, 1)
    mean = s / count
    var = jnp.maximum(ss / count - mean * mean, 0.0)   # biased variance (f32)
    inv = jax.lax.rsqrt(var + EPS)
    scale = gamma.reshape(-1, 1) * inv
    shift = beta.reshape(-1, 1) - mean * scale
    return scale.astype(jnp.float32), shift.astype(jnp.float32)


@jax.jit
def residual_block_3d(x_ncdhw, params):
    """Forward pass of ResidualBlock3D (training-mode BatchNorm, fresh nn.Module)."""
    x = x_ncdhw.astype(jnp.float32)
    N, C, D, H, W = x.shape
    M = N * D * H * W
    tm = min(TM, _round_up(M, 128))
    m_pad = _round_up(M, tm)
    k_pad = _round_up(KSIZE ** 3 * C, 16)        # bf16 sublane-friendly contraction dim

    x_cm = jnp.transpose(x, (1, 0, 2, 3, 4))     # (C, N, D, H, W)  channel-major
    resT = jnp.pad(x_cm.reshape(C, M), ((0, 0), (0, m_pad - M)))

    w1T = _fold_weight_T(params["w1"], k_pad)
    w2T = _fold_weight_T(params["w2"], k_pad)
    # NOTE: params["b1"] / params["b2"] are intentionally unused — conv bias cancels
    # exactly under batch-statistics BatchNorm.

    # ---- stage 1: conv1 -> BN1 -> ReLU
    xcol1 = _im2col_T(x_cm, k_pad, m_pad)
    y1, s1, ss1 = _conv_stats(xcol1, w1T, tm)
    scale1, shift1 = _bn_affine(s1, ss1, params["g1"], params["beta1"], float(M))
    h1 = _affine_relu(y1, scale1, shift1, tm, jnp.bfloat16)      # (C, m_pad) bf16

    # ---- stage 2: conv2 -> BN2 -> +residual -> ReLU
    h1_cm = h1[:, :M].reshape(C, N, D, H, W)
    xcol2 = _im2col_T(h1_cm, k_pad, m_pad)
    y2, s2, ss2 = _conv_stats(xcol2, w2T, tm)
    scale2, shift2 = _bn_affine(s2, ss2, params["g2"], params["beta2"], float(M))
    outT = _affine_add_relu(y2, scale2, shift2, resT, tm)        # (C, m_pad) f32

    out_cm = outT[:, :M].reshape(C, N, D, H, W)
    return jnp.transpose(out_cm, (1, 0, 2, 3, 4))                # back to NCDHW


# ----------------------- pure-JAX f32 reference (verification) ----------------


def _bn_train(x_ncdhw, gamma, beta):
    mean = x_ncdhw.mean(axis=(0, 2, 3, 4), keepdims=True)
    var = jnp.square(x_ncdhw - mean).mean(axis=(0, 2, 3, 4), keepdims=True)
    g = gamma.reshape(1, -1, 1, 1, 1)
    b = beta.reshape(1, -1, 1, 1, 1)
    return (x_ncdhw - mean) / jnp.sqrt(var + EPS) * g + b


def _reference(x, p):
    dn = jax.lax.conv_dimension_numbers(
        x.shape, p["w1"].shape, ("NCDHW", "OIDHW", "NCDHW"))
    pad = ((1, 1), (1, 1), (1, 1))
    y = jax.lax.conv_general_dilated(x, p["w1"], (1, 1, 1), pad,
                                     dimension_numbers=dn)
    y = y + p["b1"].reshape(1, -1, 1, 1, 1)
    y = jnp.maximum(_bn_train(y, p["g1"], p["beta1"]), 0.0)
    z = jax.lax.conv_general_dilated(y, p["w2"], (1, 1, 1), pad,
                                     dimension_numbers=dn)
    z = z + p["b2"].reshape(1, -1, 1, 1, 1)
    z = _bn_train(z, p["g2"], p["beta2"])
    return jnp.maximum(z + x, 0.0)


# ------------------------------------ main -------------------------------------


if __name__ == "__main__":
    N, C, D, H, W = 2, 8, 8, 8, 8   # in_channels == out_channels (residual add)
    key = jax.random.PRNGKey(0)
    ks = jax.random.split(key, 9)
    params = {
        "w1": 0.1 * jax.random.normal(ks[0], (C, C, 3, 3, 3), jnp.float32),
        "b1": 0.1 * jax.random.normal(ks[1], (C,), jnp.float32),
        "g1": 1.0 + 0.1 * jax.random.normal(ks[2], (C,), jnp.float32),
        "beta1": 0.1 * jax.random.normal(ks[3], (C,), jnp.float32),
        "w2": 0.1 * jax.random.normal(ks[4], (C, C, 3, 3, 3), jnp.float32),
        "b2": 0.1 * jax.random.normal(ks[5], (C,), jnp.float32),
        "g2": 1.0 + 0.1 * jax.random.normal(ks[6], (C,), jnp.float32),
        "beta2": 0.1 * jax.random.normal(ks[7], (C,), jnp.float32),
    }
    x = jax.random.normal(ks[8], (N, C, D, H, W), jnp.float32)

    out = jax.block_until_ready(residual_block_3d(x, params))
    ref = jax.block_until_ready(_reference(x, params))

    assert out.shape == (N, C, D, H, W)
    max_err = float(jnp.max(jnp.abs(out - ref)))
    # Matmul operands are deliberately bf16 (per the perf review); versus the pure-f32
    # reference this yields ~1e-2-scale worst-case deviations, so gate at 5e-2.
    if max_err < 5e-2:
        print("KERNEL_OK")
    else:
        print(f"MAX_ERR={max_err}")
</pallas_src>

<mosaic_0001>
module attributes {stable_mosaic.version = 11 : i64} {
  func.func @_conv_stats_kernel(%arg0: i32, %arg1: memref<224x512xbf16, #tpu.memory_space<vmem>>, %arg2: memref<8x224xbf16, #tpu.memory_space<vmem>>, %arg3: memref<8x512xf32, #tpu.memory_space<vmem>>, %arg4: memref<1x8x1xf32, #tpu.memory_space<vmem>>, %arg5: memref<1x8x1xf32, #tpu.memory_space<vmem>>) attributes {dimension_semantics = [#tpu.dimension_semantics<parallel>], iteration_bounds = array<i64: 2>, scalar_prefetch = 0 : i64, scratch_operands = 0 : i64, tpu.core_type = #tpu.core_type<tc>, window_params = [{transform_indices = @transform_0, window_bounds = array<i64: 224, 512>}, {pipeline_mode = #tpu.pipeline_mode<synchronous>, transform_indices = @transform_1, window_bounds = array<i64: 8, 224>}, {transform_indices = @transform_2, window_bounds = array<i64: 8, 512>}, {transform_indices = @transform_3, window_bounds = array<i64: 1, 8, 1>}, {transform_indices = @transform_4, window_bounds = array<i64: 1, 8, 1>}]} {
    %c0 = arith.constant 0 : index
    %c0_0 = arith.constant 0 : index
    %0 = vector.load %arg2[%c0, %c0_0] : memref<8x224xbf16, #tpu.memory_space<vmem>>, vector<8x224xbf16>
    %c0_1 = arith.constant 0 : index
    %c0_2 = arith.constant 0 : index
    %1 = vector.load %arg1[%c0_1, %c0_2] : memref<224x512xbf16, #tpu.memory_space<vmem>>, vector<224x512xbf16>
    %cst = arith.constant dense<0.000000e+00> : vector<8x512xf32>
    %2 = tpu.matmul %0, %1, %cst {dimension_numbers = #tpu.dot_dimension_numbers<[1], [0], [0], [1], [0, 0, 1, 1], [], []>} : vector<8x224xbf16>, vector<224x512xbf16>, vector<8x512xf32> -> vector<8x512xf32>
    %c0_3 = arith.constant 0 : index
    %c0_4 = arith.constant 0 : index
    %3 = vector.load %arg3[%c0_3, %c0_4] : memref<8x512xf32, #tpu.memory_space<vmem>>, vector<8x512xf32>
    tpu.vector_store %arg3[%c0_3, %c0_4], %2 {strides = array<i32>} : memref<8x512xf32, #tpu.memory_space<vmem>>, vector<8x512xf32>,
    %cst_5 = arith.constant dense<0.000000e+00> : vector<8xf32>
    %4 = vector.multi_reduction <add>, %2, %cst_5 [1] : vector<8x512xf32> to vector<8xf32>
    %5 = vector.shape_cast %4 : vector<8xf32> to vector<8x1xf32>
    %c0_6 = arith.constant 0 : index
    %c0_7 = arith.constant 0 : index
    %c0_8 = arith.constant 0 : index
    %6 = vector.load %arg4[%c0_6, %c0_7, %c0_8] : memref<1x8x1xf32, #tpu.memory_space<vmem>>, vector<1x8x1xf32>
    %7 = vector.shape_cast %6 : vector<1x8x1xf32> to vector<8x1xf32>
    %8 = vector.shape_cast %5 : vector<8x1xf32> to vector<1x8x1xf32>
    tpu.vector_store %arg4[%c0_6, %c0_7, %c0_8], %8 {strides = array<i32>} : memref<1x8x1xf32, #tpu.memory_space<vmem>>, vector<1x8x1xf32>,
    %9 = arith.mulf %2, %2 : vector<8x512xf32>
    %cst_9 = arith.constant dense<0.000000e+00> : vector<8xf32>
    %10 = vector.multi_reduction <add>, %9, %cst_9 [1] : vector<8x512xf32> to vector<8xf32>
    %11 = vector.shape_cast %10 : vector<8xf32> to vector<8x1xf32>
    %c0_10 = arith.constant 0 : index
    %c0_11 = arith.constant 0 : index
    %c0_12 = arith.constant 0 : index
    %12 = vector.load %arg5[%c0_10, %c0_11, %c0_12] : memref<1x8x1xf32, #tpu.memory_space<vmem>>, vector<1x8x1xf32>
    %13 = vector.shape_cast %12 : vector<1x8x1xf32> to vector<8x1xf32>
    %14 = vector.shape_cast %11 : vector<8x1xf32> to vector<1x8x1xf32>
    tpu.vector_store %arg5[%c0_10, %c0_11, %c0_12], %14 {strides = array<i32>} : memref<1x8x1xf32, #tpu.memory_space<vmem>>, vector<1x8x1xf32>,
    return
  }
  func.func @transform_0(%arg0: i32) -> (i32, i32) {
    %c0_i32 = arith.constant 0 : i32
    %c0_i32_0 = arith.constant 0 : i32
    return %c0_i32, %arg0 : i32, i32
  }
  func.func @transform_1(%arg0: i32) -> (i32, i32) {
    %c0_i32 = arith.constant 0 : i32
    %c0_i32_0 = arith.constant 0 : i32
    %c0_i32_1 = arith.constant 0 : i32
    return %c0_i32, %c0_i32_0 : i32, i32
  }
  func.func @transform_2(%arg0: i32) -> (i32, i32) {
    %c0_i32 = arith.constant 0 : i32
    %c0_i32_0 = arith.constant 0 : i32
    return %c0_i32, %arg0 : i32, i32
  }
  func.func @transform_3(%arg0: i32) -> (i32, i32, i32) {
    %c0_i32 = arith.constant 0 : i32
    %c0_i32_0 = arith.constant 0 : i32
    %c0_i32_1 = arith.constant 0 : i32
    return %arg0, %c0_i32, %c0_i32_0 : i32, i32, i32
  }
  func.func @transform_4(%arg0: i32) -> (i32, i32, i32) {
    %c0_i32 = arith.constant 0 : i32
    %c0_i32_0 = arith.constant 0 : i32
    %c0_i32_1 = arith.constant 0 : i32
    return %arg0, %c0_i32, %c0_i32_0 : i32, i32, i32
  }
}

module attributes {stable_mosaic.version = 11 : i64} {
  func.func @_affine_relu_kernel(%arg0: i32, %arg1: memref<8x512xf32, #tpu.memory_space<vmem>>, %arg2: memref<8x1xf32, #tpu.memory_space<vmem>>, %arg3: memref<8x1xf32, #tpu.memory_space<vmem>>, %arg4: memref<8x512xbf16, #tpu.memory_space<vmem>>) attributes {dimension_semantics = [#tpu.dimension_semantics<parallel>], iteration_bounds = array<i64: 2>, scalar_prefetch = 0 : i64, scratch_operands = 0 : i64, tpu.core_type = #tpu.core_type<tc>, window_params = [{transform_indices = @transform_0, window_bounds = array<i64: 8, 512>}, {pipeline_mode = #tpu.pipeline_mode<synchronous>, transform_indices = @transform_1, window_bounds = array<i64: 8, 1>}, {pipeline_mode = #tpu.pipeline_mode<synchronous>, transform_indices = @transform_2, window_bounds = array<i64: 8, 1>}, {transform_indices = @transform_3, window_bounds = array<i64: 8, 512>}]} {
    %c0 = arith.constant 0 : index
    %c0_0 = arith.constant 0 : index
    %0 = vector.load %arg1[%c0, %c0_0] : memref<8x512xf32, #tpu.memory_space<vmem>>, vector<8x512xf32>
    %c0_1 = arith.constant 0 : index
    %c0_2 = arith.constant 0 : index
    %1 = vector.load %arg2[%c0_1, %c0_2] : memref<8x1xf32, #tpu.memory_space<vmem>>, vector<8x1xf32>
    %2 = vector.broadcast %1 : vector<8x1xf32> to vector<8x512xf32>
    %3 = arith.mulf %0, %2 : vector<8x512xf32>
    %c0_3 = arith.constant 0 : index
    %c0_4 = arith.constant 0 : index
    %4 = vector.load %arg3[%c0_3, %c0_4] : memref<8x1xf32, #tpu.memory_space<vmem>>, vector<8x1xf32>
    %5 = vector.broadcast %4 : vector<8x1xf32> to vector<8x512xf32>
    %6 = arith.addf %3, %5 : vector<8x512xf32>
    %cst = arith.constant 0.000000e+00 : f32
    %7 = vector.broadcast %cst : f32 to vector<8x512xf32>
    %8 = arith.maximumf %6, %7 : vector<8x512xf32>
    %9 = arith.truncf %8 : vector<8x512xf32> to vector<8x512xbf16>
    %c0_5 = arith.constant 0 : index
    %c0_6 = arith.constant 0 : index
    %10 = vector.load %arg4[%c0_5, %c0_6] : memref<8x512xbf16, #tpu.memory_space<vmem>>, vector<8x512xbf16>
    tpu.vector_store %arg4[%c0_5, %c0_6], %9 {strides = array<i32>} : memref<8x512xbf16, #tpu.memory_space<vmem>>, vector<8x512xbf16>,
    return
  }
  func.func @transform_0(%arg0: i32) -> (i32, i32) {
    %c0_i32 = arith.constant 0 : i32
    %c0_i32_0 = arith.constant 0 : i32
    return %c0_i32, %arg0 : i32, i32
  }
  func.func @transform_1(%arg0: i32) -> (i32, i32) {
    %c0_i32 = arith.constant 0 : i32
    %c0_i32_0 = arith.constant 0 : i32
    %c0_i32_1 = arith.constant 0 : i32
    return %c0_i32, %c0_i32_0 : i32, i32
  }
  func.func @transform_2(%arg0: i32) -> (i32, i32) {
    %c0_i32 = arith.constant 0 : i32
    %c0_i32_0 = arith.constant 0 : i32
    %c0_i32_1 = arith.constant 0 : i32
    return %c0_i32, %c0_i32_0 : i32, i32
  }
  func.func @transform_3(%arg0: i32) -> (i32, i32) {
    %c0_i32 = arith.constant 0 : i32
    %c0_i32_0 = arith.constant 0 : i32
    return %c0_i32, %arg0 : i32, i32
  }
}

module attributes {stable_mosaic.version = 11 : i64} {
  func.func @_affine_add_relu_kernel(%arg0: i32, %arg1: memref<8x512xf32, #tpu.memory_space<vmem>>, %arg2: memref<8x1xf32, #tpu.memory_space<vmem>>, %arg3: memref<8x1xf32, #tpu.memory_space<vmem>>, %arg4: memref<8x512xf32, #tpu.memory_space<vmem>>, %arg5: memref<8x512xf32, #tpu.memory_space<vmem>>) attributes {dimension_semantics = [#tpu.dimension_semantics<parallel>], iteration_bounds = array<i64: 2>, scalar_prefetch = 0 : i64, scratch_operands = 0 : i64, tpu.core_type = #tpu.core_type<tc>, window_params = [{transform_indices = @transform_0, window_bounds = array<i64: 8, 512>}, {pipeline_mode = #tpu.pipeline_mode<synchronous>, transform_indices = @transform_1, window_bounds = array<i64: 8, 1>}, {pipeline_mode = #tpu.pipeline_mode<synchronous>, transform_indices = @transform_2, window_bounds = array<i64: 8, 1>}, {transform_indices = @transform_3, window_bounds = array<i64: 8, 512>}, {transform_indices = @transform_4, window_bounds = array<i64: 8, 512>}]} {
    %c0 = arith.constant 0 : index
    %c0_0 = arith.constant 0 : index
    %0 = vector.load %arg1[%c0, %c0_0] : memref<8x512xf32, #tpu.memory_space<vmem>>, vector<8x512xf32>
    %c0_1 = arith.constant 0 : index
    %c0_2 = arith.constant 0 : index
    %1 = vector.load %arg2[%c0_1, %c0_2] : memref<8x1xf32, #tpu.memory_space<vmem>>, vector<8x1xf32>
    %2 = vector.broadcast %1 : vector<8x1xf32> to vector<8x512xf32>
    %3 = arith.mulf %0, %2 : vector<8x512xf32>
    %c0_3 = arith.constant 0 : index
    %c0_4 = arith.constant 0 : index
    %4 = vector.load %arg3[%c0_3, %c0_4] : memref<8x1xf32, #tpu.memory_space<vmem>>, vector<8x1xf32>
    %5 = vector.broadcast %4 : vector<8x1xf32> to vector<8x512xf32>
    %6 = arith.addf %3, %5 : vector<8x512xf32>
    %c0_5 = arith.constant 0 : index
    %c0_6 = arith.constant 0 : index
    %7 = vector.load %arg4[%c0_5, %c0_6] : memref<8x512xf32, #tpu.memory_space<vmem>>, vector<8x512xf32>
    %8 = arith.addf %6, %7 : vector<8x512xf32>
    %cst = arith.constant 0.000000e+00 : f32
    %9 = vector.broadcast %cst : f32 to vector<8x512xf32>
    %10 = arith.maximumf %8, %9 : vector<8x512xf32>
    %c0_7 = arith.constant 0 : index
    %c0_8 = arith.constant 0 : index
    %11 = vector.load %arg5[%c0_7, %c0_8] : memref<8x512xf32, #tpu.memory_space<vmem>>, vector<8x512xf32>
    tpu.vector_store %arg5[%c0_7, %c0_8], %10 {strides = array<i32>} : memref<8x512xf32, #tpu.memory_space<vmem>>, vector<8x512xf32>,
    return
  }
  func.func @transform_0(%arg0: i32) -> (i32, i32) {
    %c0_i32 = arith.constant 0 : i32
    %c0_i32_0 = arith.constant 0 : i32
    return %c0_i32, %arg0 : i32, i32
  }
  func.func @transform_1(%arg0: i32) -> (i32, i32) {
    %c0_i32 = arith.constant 0 : i32
    %c0_i32_0 = arith.constant 0 : i32
    %c0_i32_1 = arith.constant 0 : i32
    return %c0_i32, %c0_i32_0 : i32, i32
  }
  func.func @transform_2(%arg0: i32) -> (i32, i32) {
    %c0_i32 = arith.constant 0 : i32
    %c0_i32_0 = arith.constant 0 : i32
    %c0_i32_1 = arith.constant 0 : i32
    return %c0_i32, %c0_i32_0 : i32, i32
  }
  func.func @transform_3(%arg0: i32) -> (i32, i32) {
    %c0_i32 = arith.constant 0 : i32
    %c0_i32_0 = arith.constant 0 : i32
    return %c0_i32, %arg0 : i32, i32
  }
  func.func @transform_4(%arg0: i32) -> (i32, i32) {
    %c0_i32 = arith.constant 0 : i32
    %c0_i32_0 = arith.constant 0 : i32
    return %c0_i32, %arg0 : i32, i32
  }
}

</mosaic_0001>

<bundles_post_ra>
// kernel: residual_block_3d.4
= control target key start
LH: loop header
LB: loop body
LE: loop exit
PB: predicated region body
PF: predicated region fallthrough
CT: control target
= control target key end

     0   :  { %s1161_s15 = smov 0   ;;  %s1163_s16 = smov 0   ;;  %s1405_s0 = inlined_call_operand.vmem [shape: bf16[224,1024], index: 0, kind: input, shape index: {}]   ;;  %s1406_s1 = inlined_call_operand.vmem [shape: bf16[8,224], index: 1, kind: input, shape index: {}]   ;;  %s1407_s2 = inlined_call_operand.vmem [shape: f32[8,1024], index: 2, kind: output, shape index: {0}]   ;;  %s1408_s3 = inlined_call_operand.vmem [shape: f32[2,8,1], index: 3, kind: output, shape index: {1}]   ;;  %s1409_s4 = inlined_call_operand.vmem [shape: f32[2,8,1], index: 4, kind: output, shape index: {2}]  }
   0x1   :  { %s1165_s17 = smov 0  }
   0x2 LB: > { %s1177_s18 = sadd.s32 4294967295, %s1134_s17   ;;  %s1180_s19 = sadd.s32 1, %s1134_s17   ;;  %s1134_s17 = sphi %s1165_s17, %s1412_s17   ;;  %s1130_s16 = sphi %s1163_s16, %s1411_s16   ;;  %s1126_s15 = sphi %s1161_s15, %s1410_s15  }
   0x3   : > { %s19_s20 = ssub.s32 %s1134_s17, %s1180_s19  ;;  %s22_s21 = sadd.s32 1, %s1130_s16 }
   0x4   : > { %p20_p0 = scmp.eq.s32.totalorder %s19_s20, 0  ;;  %p29_p1 = scmp.ne.s32.totalorder %s1130_s16, %s1126_s15 }
   0x5   : > { %p30_p2 = scmp.eq.s32.totalorder %s1134_s17, 0  ;;  %p929_p4 = scmp.ge.s32.totalorder %s1134_s17, 2 }
   0x6   : > { %s1189_s22 = scalar_select %p20_p0, %s1130_s16, %s22_s21  }
   0x7   : > { %p31_p3 = por %p30_p2, %p29_p1  ;;  %157 = sbr.rel (%p929_p4) target bundleno = 46 (0x2e), region = 20 }
   0xe   : > { %160 = sbr.rel (!%p31_p3) target bundleno = 46 (0x2e), region = 24  ;;  %s162_s23 = sand.u32 (%p31_p3), 1, %s1130_s16  }
   0xf   : > { %s999_s24 = sshll.u32 (%p31_p3), %s1134_s17, 4  ;;  %s1000_s25 = smul.u32 (%p31_p3), 448, %s162_s23 }
  0x10   : > { %s1197_s28 = scalar_lea.vmem (%p31_p3), %s1405_s0, %s999_s24 }
  0x11   : > { %v180_v0 = vld [vmem:[%s1197_s28] sm:$0xff] (%p31_p3)  ;;  %v182_v1 = vld [vmem:[%s1197_s28 + $0x8] sm:$0xff] (%p31_p3)  ;;  %s1205_s29 = scalar_lea.vmem (%p31_p3), [#allocation2], %s1000_s25 }
  0x12   : > { %v184_v2 = vld [vmem:[%s1197_s28 + $0x20] sm:$0xff] (%p31_p3)  ;;  %v186_v3 = vld [vmem:[%s1197_s28 + $0x28] sm:$0xff] (%p31_p3)  ;;  %181 = vst [vmem:[%s1205_s29] sm:$0xff] (%p31_p3), %v180_v0  ;;  %183 = vst [vmem:[%s1205_s29 + $0x8] sm:$0xff] (%p31_p3), %v182_v1 }
  0x13   : > { %v188_v4 = vld [vmem:[%s1197_s28 + $0x40] sm:$0xff] (%p31_p3)  ;;  %v190_v5 = vld [vmem:[%s1197_s28 + $0x48] sm:$0xff] (%p31_p3)  ;;  %185 = vst [vmem:[%s1205_s29 + $0x10] sm:$0xff] (%p31_p3), %v184_v2  ;;  %187 = vst [vmem:[%s1205_s29 + $0x18] sm:$0xff] (%p31_p3), %v186_v3 }
  0x14   : > { %189 = vst [vmem:[%s1205_s29 + $0x20] sm:$0xff] (%p31_p3), %v188_v4  ;;  %191 = vst [vmem:[%s1205_s29 + $0x28] sm:$0xff] (%p31_p3), %v190_v5  ;;  %v192_v6 = vld [vmem:[%s1197_s28 + $0x60] sm:$0xff] (%p31_p3)  ;;  %v194_v7 = vld [vmem:[%s1197_s28 + $0x68] sm:$0xff] (%p31_p3) }
  0x15   : > { %v196_v8 = vld [vmem:[%s1197_s28 + $0x80] sm:$0xff]  ;;  %193 = vst [vmem:[%s1205_s29 + $0x30] sm:$0xff] %v192_v6  ;;  %195 = vst [vmem:[%s1205_s29 + $0x38] sm:$0xff] %v194_v7  ;;  %v198_v9 = vld [vmem:[%s1197_s28 + $0x88] sm:$0xff] }
  0x16   : > { %197 = vst [vmem:[%s1205_s29 + $0x40] sm:$0xff] %v196_v8  ;;  %v200_v10 = vld [vmem:[%s1197_s28 + $0xa0] sm:$0xff]  ;;  %v202_v11 = vld [vmem:[%s1197_s28 + $0xa8] sm:$0xff]  ;;  %199 = vst [vmem:[%s1205_s29 + $0x48] sm:$0xff] %v198_v9 }
  0x17   : > { %201 = vst [vmem:[%s1205_s29 + $0x50] sm:$0xff] %v200_v10  ;;  %203 = vst [vmem:[%s1205_s29 + $0x58] sm:$0xff] %v202_v11  ;;  %v204_v12 = vld [vmem:[%s1197_s28 + $0xc0] sm:$0xff]  ;;  %v206_v13 = vld [vmem:[%s1197_s28 + $0xc8] sm:$0xff] }
  0x18   : > { %v208_v14 = vld [vmem:[%s1197_s28 + $0xe0] sm:$0xff]  ;;  %205 = vst [vmem:[%s1205_s29 + $0x60] sm:$0xff] %v204_v12  ;;  %207 = vst [vmem:[%s1205_s29 + $0x68] sm:$0xff] %v206_v13  ;;  %v210_v15 = vld [vmem:[%s1197_s28 + $0xe8] sm:$0xff] }
  0x19   : > { %209 = vst [vmem:[%s1205_s29 + $0x70] sm:$0xff] %v208_v14  ;;  %v212_v16 = vld [vmem:[%s1197_s28 + $0x100] sm:$0xff]  ;;  %v214_v17 = vld [vmem:[%s1197_s28 + $0x108] sm:$0xff]  ;;  %211 = vst [vmem:[%s1205_s29 + $0x78] sm:$0xff] %v210_v15 }
  0x1a   : > { %213 = vst [vmem:[%s1205_s29 + $0x80] sm:$0xff] %v212_v16  ;;  %215 = vst [vmem:[%s1205_s29 + $0x88] sm:$0xff] %v214_v17  ;;  %v216_v18 = vld [vmem:[%s1197_s28 + $0x120] sm:$0xff]  ;;  %v218_v19 = vld [vmem:[%s1197_s28 + $0x128] sm:$0xff] }
  0x1b   : > { %v220_v20 = vld [vmem:[%s1197_s28 + $0x140] sm:$0xff]  ;;  %217 = vst [vmem:[%s1205_s29 + $0x90] sm:$0xff] %v216_v18  ;;  %219 = vst [vmem:[%s1205_s29 + $0x98] sm:$0xff] %v218_v19  ;;  %v222_v21 = vld [vmem:[%s1197_s28 + $0x148] sm:$0xff] }
  0x1c   : > { %221 = vst [vmem:[%s1205_s29 + $0xa0] sm:$0xff] %v220_v20  ;;  %v224_v22 = vld [vmem:[%s1197_s28 + $0x160] sm:$0xff]  ;;  %v226_v23 = vld [vmem:[%s1197_s28 + $0x168] sm:$0xff]  ;;  %223 = vst [vmem:[%s1205_s29 + $0xa8] sm:$0xff] %v222_v21 }
  0x1d   : > { %225 = vst [vmem:[%s1205_s29 + $0xb0] sm:$0xff] %v224_v22  ;;  %227 = vst [vmem:[%s1205_s29 + $0xb8] sm:$0xff] %v226_v23  ;;  %v228_v24 = vld [vmem:[%s1197_s28 + $0x180] sm:$0xff]  ;;  %v230_v25 = vld [vmem:[%s1197_s28 + $0x188] sm:$0xff] }
  0x1e   : > { %v232_v26 = vld [vmem:[%s1197_s28 + $0x1a0] sm:$0xff]  ;;  %229 = vst [vmem:[%s1205_s29 + $0xc0] sm:$0xff] %v228_v24  ;;  %231 = vst [vmem:[%s1205_s29 + $0xc8] sm:$0xff] %v230_v25  ;;  %v234_v27 = vld [vmem:[%s1197_s28 + $0x1a8] sm:$0xff] }
  0x1f   : > { %233 = vst [vmem:[%s1205_s29 + $0xd0] sm:$0xff] %v232_v26  ;;  %v236_v28 = vld [vmem:[%s1197_s28 + $0x1c0] sm:$0xff]  ;;  %v238_v29 = vld [vmem:[%s1197_s28 + $0x1c8] sm:$0xff]  ;;  %235 = vst [vmem:[%s1205_s29 + $0xd8] sm:$0xff] %v234_v27 }
  0x20   : > { %237 = vst [vmem:[%s1205_s29 + $0xe0] sm:$0xff] %v236_v28  ;;  %239 = vst [vmem:[%s1205_s29 + $0xe8] sm:$0xff] %v238_v29  ;;  %v240_v30 = vld [vmem:[%s1197_s28 + $0x1e0] sm:$0xff]  ;;  %v242_v31 = vld [vmem:[%s1197_s28 + $0x1e8] sm:$0xff] }
  0x21   : > { %v244_v32 = vld [vmem:[%s1197_s28 + $0x200] sm:$0xff]  ;;  %241 = vst [vmem:[%s1205_s29 + $0xf0] sm:$0xff] %v240_v30  ;;  %243 = vst [vmem:[%s1205_s29 + $0xf8] sm:$0xff] %v242_v31  ;;  %v246_v33 = vld [vmem:[%s1197_s28 + $0x208] sm:$0xff] }
  0x22   : > { %245 = vst [vmem:[%s1205_s29 + $0x100] sm:$0xff] %v244_v32  ;;  %v248_v34 = vld [vmem:[%s1197_s28 + $0x220] sm:$0xff]  ;;  %v250_v35 = vld [vmem:[%s1197_s28 + $0x228] sm:$0xff]  ;;  %247 = vst [vmem:[%s1205_s29 + $0x108] sm:$0xff] %v246_v33 }
  0x23   : > { %249 = vst [vmem:[%s1205_s29 + $0x110] sm:$0xff] %v248_v34  ;;  %251 = vst [vmem:[%s1205_s29 + $0x118] sm:$0xff] %v250_v35  ;;  %v252_v36 = vld [vmem:[%s1197_s28 + $0x240] sm:$0xff]  ;;  %v254_v37 = vld [vmem:[%s1197_s28 + $0x248] sm:$0xff] }
  0x24   : > { %v256_v38 = vld [vmem:[%s1197_s28 + $0x260] sm:$0xff]  ;;  %253 = vst [vmem:[%s1205_s29 + $0x120] sm:$0xff] %v252_v36  ;;  %255 = vst [vmem:[%s1205_s29 + $0x128] sm:$0xff] %v254_v37  ;;  %v258_v39 = vld [vmem:[%s1197_s28 + $0x268] sm:$0xff] }
  0x25   : > { %257 = vst [vmem:[%s1205_s29 + $0x130] sm:$0xff] %v256_v38  ;;  %v260_v40 = vld [vmem:[%s1197_s28 + $0x280] sm:$0xff]  ;;  %v262_v41 = vld [vmem:[%s1197_s28 + $0x288] sm:$0xff]  ;;  %259 = vst [vmem:[%s1205_s29 + $0x138] sm:$0xff] %v258_v39 }
  0x26   : > { %261 = vst [vmem:[%s1205_s29 + $0x140] sm:$0xff] %v260_v40  ;;  %263 = vst [vmem:[%s1205_s29 + $0x148] sm:$0xff] %v262_v41  ;;  %v264_v42 = vld [vmem:[%s1197_s28 + $0x2a0] sm:$0xff]  ;;  %v266_v43 = vld [vmem:[%s1197_s28 + $0x2a8] sm:$0xff] }
  0x27   : > { %v268_v44 = vld [vmem:[%s1197_s28 + $0x2c0] sm:$0xff]  ;;  %265 = vst [vmem:[%s1205_s29 + $0x150] sm:$0xff] %v264_v42  ;;  %267 = vst [vmem:[%s1205_s29 + $0x158] sm:$0xff] %v266_v43  ;;  %v270_v45 = vld [vmem:[%s1197_s28 + $0x2c8] sm:$0xff] }
  0x28   : > { %269 = vst [vmem:[%s1205_s29 + $0x160] sm:$0xff] %v268_v44  ;;  %v272_v46 = vld [vmem:[%s1197_s28 + $0x2e0] sm:$0xff]  ;;  %v274_v47 = vld [vmem:[%s1197_s28 + $0x2e8] sm:$0xff]  ;;  %271 = vst [vmem:[%s1205_s29 + $0x168] sm:$0xff] %v270_v45 }
  0x29   : > { %273 = vst [vmem:[%s1205_s29 + $0x170] sm:$0xff] %v272_v46  ;;  %275 = vst [vmem:[%s1205_s29 + $0x178] sm:$0xff] %v274_v47  ;;  %v276_v48 = vld [vmem:[%s1197_s28 + $0x300] sm:$0xff]  ;;  %v278_v49 = vld [vmem:[%s1197_s28 + $0x308] sm:$0xff] }
  0x2a   : > { %v280_v50 = vld [vmem:[%s1197_s28 + $0x320] sm:$0xff]  ;;  %277 = vst [vmem:[%s1205_s29 + $0x180] sm:$0xff] %v276_v48  ;;  %279 = vst [vmem:[%s1205_s29 + $0x188] sm:$0xff] %v278_v49  ;;  %v282_v51 = vld [vmem:[%s1197_s28 + $0x328] sm:$0xff] }
  0x2b   : > { %281 = vst [vmem:[%s1205_s29 + $0x190] sm:$0xff] %v280_v50  ;;  %v284_v52 = vld [vmem:[%s1197_s28 + $0x340] sm:$0xff]  ;;  %v286_v53 = vld [vmem:[%s1197_s28 + $0x348] sm:$0xff]  ;;  %283 = vst [vmem:[%s1205_s29 + $0x198] sm:$0xff] %v282_v51 }
  0x2c   : > { %285 = vst [vmem:[%s1205_s29 + $0x1a0] sm:$0xff] %v284_v52  ;;  %287 = vst [vmem:[%s1205_s29 + $0x1a8] sm:$0xff] %v286_v53  ;;  %v288_v54 = vld [vmem:[%s1197_s28 + $0x360] sm:$0xff]  ;;  %v290_v55 = vld [vmem:[%s1197_s28 + $0x368] sm:$0xff] }
  0x2d   : > { %289 = vst [vmem:[%s1205_s29 + $0x1b0] sm:$0xff] %v288_v54  ;;  %291 = vst [vmem:[%s1205_s29 + $0x1b8] sm:$0xff] %v290_v55 }
  0x2e PF: > { %p932_p5 = scmp.ge.s32.totalorder %s1134_s17, 1  ;;  %p296_p6 = scmp.lt.s32.totalorder %s1134_s17, 3 }
  0x30   : > { %p297_p7 = pnand %p932_p5, %p296_p6 }
  0x31   : > { %s303_s30 = sand.u32 (!%p297_p7), 1, %s1126_s15   ;;  %v1319_v56 = vld [vmem:[%s1406_s1] sm:$0xff] (!%p297_p7)  ;;  %vm695_vm0 = vcmask (!%p297_p7), 785408   ;;  %s933_s9 = sshll.u32 (!%p297_p7), %s1177_s18, 2  ;;  %vm790_vm1 = vcmask (!%p297_p7), 7168  }
  0x32   : > { %300 = sbr.rel (%p297_p7) target bundleno = 477 (0x1dd), region = 47  ;;  %v938_v57 = vcombine.high (!%p297_p7), %v1319_v56, %v1319_v56  ;;  %v937_v50 = vcombine.low (!%p297_p7), %v1319_v56, %v1319_v56  ;;  %p338_p8 = scmp.lt.s32.totalorder (!%p297_p7), %s933_s9, 7 }
  0x33   : > { %s1001_s7 = smul.u32 (!%p297_p7), 448, %s303_s30  ;;  %p343_p9 = scmp.lt.s32.totalorder (!%p297_p7), %s1177_s18, 1 }
  0x34   : > { %995 = vmatprep.mubr.msk.bf16.mxu0 (!%p297_p7), %vm695_vm0, %v938_v57  ;;  %996 = vmatprep.mubr.msk.bf16.mxu1 (!%p297_p7), %vm695_vm0, %v938_v57 }
  0x35   : > { %s1323_s8 = scalar_lea.vmem (!%p297_p7), [#allocation2], %s1001_s7 }
  0x36   : > { %v1026_v58 = vld [vmem:[%s1323_s8 + $0x4] ss:$16 sps:$4 sm:$0xff] (!%p297_p7)   ;;  %v1028_v59 = vld [vmem:[%s1323_s8 + $0xc] ss:$16 sps:$4 sm:$0xff] (!%p297_p7)   ;;  %v1030_v60 = vld [vmem:[%s1323_s8] ss:$16 sps:$4 sm:$0xff] (!%p297_p7)  }
  0x37   : > { %699 = vmatprep.subr.bf16.mxu0 (!%p297_p7), %v1026_v58  ;;  %v1031_v61 = vld [vmem:[%s1323_s8 + $0x8] ss:$16 sps:$4 sm:$0xff] (!%p297_p7)   ;;  %740 = vmatprep.subr.bf16.mxu1 (!%p297_p7), %v1028_v59  ;;  %v1032_v62 = vld [vmem:[%s1323_s8 + $0x24] ss:$16 sps:$4 sm:$0xff] (!%p297_p7)   ;;  %v1034_v63 = vld [vmem:[%s1323_s8 + $0x2c] ss:$16 sps:$4 sm:$0xff] (!%p297_p7)  }
  0x38   : > { %700 = vmatpush1.bf16.msra.mxu0 (!%p297_p7), %v1030_v60  ;;  %741 = vmatpush1.bf16.msra.mxu1 (!%p297_p7), %v1031_v61  ;;  %v1036_v0 = vld [vmem:[%s1323_s8 + $0x20] ss:$16 sps:$4 sm:$0xff] (!%p297_p7)   ;;  %v1037_v1 = vld [vmem:[%s1323_s8 + $0x28] ss:$16 sps:$4 sm:$0xff] (!%p297_p7)   ;;  %v1038_v2 = vld [vmem:[%s1323_s8 + $0x44] ss:$16 sps:$4 sm:$0xff] (!%p297_p7)  }
  0x39   : > { %701 = vmatprep.subr.bf16.mxu0 %v1032_v62  ;;  %742 = vmatprep.subr.bf16.mxu1 %v1034_v63  ;;  %v1040_v3 = vld [vmem:[%s1323_s8 + $0x4c] ss:$16 sps:$4 sm:$0xff]   ;;  %v1042_v4 = vld [vmem:[%s1323_s8 + $0x40] ss:$16 sps:$4 sm:$0xff]   ;;  %v1043_v5 = vld [vmem:[%s1323_s8 + $0x48] ss:$16 sps:$4 sm:$0xff]  }
  0x3a   : > { %v1044_v6 = vld [vmem:[%s1323_s8 + $0x64] ss:$16 sps:$4 sm:$0xff]   ;;  %v1046_v7 = vld [vmem:[%s1323_s8 + $0x6c] ss:$16 sps:$4 sm:$0xff]   ;;  %v1048_v8 = vld [vmem:[%s1323_s8 + $0x60] ss:$16 sps:$4 sm:$0xff]  }
  0x3b   : > { %v1049_v9 = vld [vmem:[%s1323_s8 + $0x68] ss:$16 sps:$4 sm:$0xff]   ;;  %v1050_v10 = vld [vmem:[%s1323_s8 + $0x84] ss:$16 sps:$4 sm:$0xff]   ;;  %v1052_v11 = vld [vmem:[%s1323_s8 + $0x8c] ss:$16 sps:$4 sm:$0xff]  }
  0x3c   : > { %702 = vmatpush1.bf16.msra.mxu0 %v1036_v0  ;;  %743 = vmatpush1.bf16.msra.mxu1 %v1037_v1  ;;  %v1054_v12 = vld [vmem:[%s1323_s8 + $0x80] ss:$16 sps:$4 sm:$0xff]   ;;  %v1055_v13 = vld [vmem:[%s1323_s8 + $0x88] ss:$16 sps:$4 sm:$0xff]   ;;  %v1056_v14 = vld [vmem:[%s1323_s8 + $0xa4] ss:$16 sps:$4 sm:$0xff]  }
  0x3d   : > { %703 = vmatprep.subr.bf16.mxu0 %v1038_v2  ;;  %744 = vmatprep.subr.bf16.mxu1 %v1040_v3  ;;  %v1058_v15 = vld [vmem:[%s1323_s8 + $0xac] ss:$16 sps:$4 sm:$0xff]   ;;  %v1060_v16 = vld [vmem:[%s1323_s8 + $0xa0] ss:$16 sps:$4 sm:$0xff]   ;;  %v1061_v17 = vld [vmem:[%s1323_s8 + $0xa8] ss:$16 sps:$4 sm:$0xff]  }
  0x3e   : > { %v1062_v18 = vld [vmem:[%s1323_s8 + $0xc4] ss:$16 sps:$4 sm:$0xff]   ;;  %v1064_v19 = vld [vmem:[%s1323_s8 + $0xcc] ss:$16 sps:$4 sm:$0xff]   ;;  %v1066_v20 = vld [vmem:[%s1323_s8 + $0xc0] ss:$16 sps:$4 sm:$0xff]  }
  0x3f   : > { %v1067_v21 = vld [vmem:[%s1323_s8 + $0xc8] ss:$16 sps:$4 sm:$0xff]   ;;  %v1068_v22 = vld [vmem:[%s1323_s8 + $0xe4] ss:$16 sps:$4 sm:$0xff]   ;;  %v1070_v23 = vld [vmem:[%s1323_s8 + $0xec] ss:$16 sps:$4 sm:$0xff]  }
  0x40   : > { %704 = vmatpush1.bf16.msra.mxu0 %v1042_v4  ;;  %745 = vmatpush1.bf16.msra.mxu1 %v1043_v5  ;;  %v1072_v24 = vld [vmem:[%s1323_s8 + $0xe0] ss:$16 sps:$4 sm:$0xff]   ;;  %v1073_v25 = vld [vmem:[%s1323_s8 + $0xe8] ss:$16 sps:$4 sm:$0xff]   ;;  %v1074_v26 = vld [vmem:[%s1323_s8 + $0x104] ss:$16 sps:$4 sm:$0xff]  }
  0x41   : > { %705 = vmatprep.subr.bf16.mxu0 %v1044_v6  ;;  %746 = vmatprep.subr.bf16.mxu1 %v1046_v7  ;;  %v1076_v27 = vld [vmem:[%s1323_s8 + $0x10c] ss:$16 sps:$4 sm:$0xff]   ;;  %v1078_v28 = vld [vmem:[%s1323_s8 + $0x100] ss:$16 sps:$4 sm:$0xff]   ;;  %v1079_v29 = vld [vmem:[%s1323_s8 + $0x108] ss:$16 sps:$4 sm:$0xff]  }
  0x42   : > { %v1080_v30 = vld [vmem:[%s1323_s8 + $0x124] ss:$16 sps:$4 sm:$0xff]   ;;  %v1082_v31 = vld [vmem:[%s1323_s8 + $0x12c] ss:$16 sps:$4 sm:$0xff]   ;;  %v1084_v32 = vld [vmem:[%s1323_s8 + $0x120] ss:$16 sps:$4 sm:$0xff]  }
  0x43   : > { %v1085_v33 = vld [vmem:[%s1323_s8 + $0x128] ss:$16 sps:$4 sm:$0xff]   ;;  %v1086_v34 = vld [vmem:[%s1323_s8 + $0x144] ss:$16 sps:$4 sm:$0xff]   ;;  %v1088_v35 = vld [vmem:[%s1323_s8 + $0x14c] ss:$16 sps:$4 sm:$0xff]  }
  0x44   : > { %706 = vmatpush1.bf16.msra.mxu0 %v1048_v8  ;;  %747 = vmatpush1.bf16.msra.mxu1 %v1049_v9  ;;  %v1090_v36 = vld [vmem:[%s1323_s8 + $0x140] ss:$16 sps:$4 sm:$0xff]   ;;  %v1091_v37 = vld [vmem:[%s1323_s8 + $0x148] ss:$16 sps:$4 sm:$0xff]   ;;  %v1092_v38 = vld [vmem:[%s1323_s8 + $0x164] ss:$16 sps:$4 sm:$0xff]  }
  0x45   : > { %707 = vmatprep.subr.bf16.mxu0 %v1050_v10  ;;  %748 = vmatprep.subr.bf16.mxu1 %v1052_v11  ;;  %v1094_v39 = vld [vmem:[%s1323_s8 + $0x16c] ss:$16 sps:$4 sm:$0xff]   ;;  %v1096_v40 = vld [vmem:[%s1323_s8 + $0x160] ss:$16 sps:$4 sm:$0xff]   ;;  %v1097_v41 = vld [vmem:[%s1323_s8 + $0x168] ss:$16 sps:$4 sm:$0xff]  }
  0x46   : > { %v1098_v42 = vld [vmem:[%s1323_s8 + $0x184] ss:$16 sps:$4 sm:$0xff]   ;;  %v1100_v43 = vld [vmem:[%s1323_s8 + $0x18c] ss:$16 sps:$4 sm:$0xff]   ;;  %v1102_v44 = vld [vmem:[%s1323_s8 + $0x180] ss:$16 sps:$4 sm:$0xff]  }
  0x47   : > { %v1103_v45 = vld [vmem:[%s1323_s8 + $0x188] ss:$16 sps:$4 sm:$0xff]   ;;  %v1104_v46 = vld [vmem:[%s1323_s8 + $0x1a4] ss:$16 sps:$4 sm:$0xff]   ;;  %v1106_v47 = vld [vmem:[%s1323_s8 + $0x1ac] ss:$16 sps:$4 sm:$0xff]  }
  0x48   : > { %708 = vmatpush1.bf16.msra.mxu0 %v1054_v12  ;;  %749 = vmatpush1.bf16.msra.mxu1 %v1055_v13  ;;  %v1108_v48 = vld [vmem:[%s1323_s8 + $0x1a0] ss:$16 sps:$4 sm:$0xff]   ;;  %v1109_v49 = vld [vmem:[%s1323_s8 + $0x1a8] ss:$16 sps:$4 sm:$0xff]   ;;  %s1414_s9 = smov (!%p338_p8, %s933_s9), 7  ;;  %s1416_s18 = smov (!%p343_p9, %s1177_s18), 1 }
  0x49   : > { %709 = vmatprep.subr.bf16.mxu0 %v1056_v14  ;;  %750 = vmatprep.subr.bf16.mxu1 %v1058_v15  ;;  %s934_s10 = sshll.u32 %s1414_s9, 3  ;;  %s935_s14 = sshll.u32 %s1416_s18, 3 }
  0x4a   : > { %s341_s13 = scalar_lea.vmem %s1407_s2, %s934_s10  ;;  %s346_s20 = scalar_lea.vmem %s1408_s3, %s935_s14 }
  0x4b   : > { %s350_s24 = scalar_lea.vmem %s1409_s4, %s935_s14 }
  0x4c   : > { %710 = vmatpush1.bf16.msra.mxu0 %v1060_v16  ;;  %751 = vmatpush1.bf16.msra.mxu1 %v1061_v17 }
  0x4d   : > { %711 = vmatprep.subr.bf16.mxu0 %v1062_v18  ;;  %752 = vmatprep.subr.bf16.mxu1 %v1064_v19 }
  0x50   : > { %712 = vmatpush1.bf16.msra.mxu0 %v1066_v20  ;;  %753 = vmatpush1.bf16.msra.mxu1 %v1067_v21 }
  0x51   : > { %713 = vmatprep.subr.bf16.mxu0 %v1068_v22  ;;  %754 = vmatprep.subr.bf16.mxu1 %v1070_v23 }
  0x54   : > { %714 = vmatpush1.bf16.msra.mxu0 %v1072_v24  ;;  %755 = vmatpush1.bf16.msra.mxu1 %v1073_v25 }
  0x55   : > { %715 = vmatprep.subr.bf16.mxu0 %v1074_v26  ;;  %756 = vmatprep.subr.bf16.mxu1 %v1076_v27 }
  0x58   : > { %716 = vmatpush1.bf16.msra.mxu0 %v1078_v28  ;;  %757 = vmatpush1.bf16.msra.mxu1 %v1079_v29 }
  0x59   : > { %717 = vmatprep.subr.bf16.mxu0 %v1080_v30  ;;  %758 = vmatprep.subr.bf16.mxu1 %v1082_v31 }
  0x5c   : > { %718 = vmatpush1.bf16.msra.mxu0 %v1084_v32  ;;  %759 = vmatpush1.bf16.msra.mxu1 %v1085_v33 }
  0x5d   : > { %719 = vmatprep.subr.bf16.mxu0 %v1086_v34  ;;  %760 = vmatprep.subr.bf16.mxu1 %v1088_v35 }
  0x60   : > { %720 = vmatpush1.bf16.msra.mxu0 %v1090_v36  ;;  %761 = vmatpush1.bf16.msra.mxu1 %v1091_v37 }
  0x61   : > { %721 = vmatprep.subr.bf16.mxu0 %v1092_v38  ;;  %762 = vmatprep.subr.bf16.mxu1 %v1094_v39 }
  0x64   : > { %722 = vmatpush1.bf16.msra.mxu0 %v1096_v40  ;;  %763 = vmatpush1.bf16.msra.mxu1 %v1097_v41 }
  0x65   : > { %723 = vmatprep.subr.bf16.mxu0 %v1098_v42  ;;  %764 = vmatprep.subr.bf16.mxu1 %v1100_v43 }
  0x68   : > { %724 = vmatpush1.bf16.msra.mxu0 %v1102_v44  ;;  %765 = vmatpush1.bf16.msra.mxu1 %v1103_v45 }
  0x69   : > { %725 = vmatprep.subr.bf16.mxu0 %v1104_v46  ;;  %766 = vmatprep.subr.bf16.mxu1 %v1106_v47 }
  0x6c   : > { %726 = vmatpush1.bf16.msra.mxu0 %v1108_v48  ;;  %767 = vmatpush1.bf16.msra.mxu1 %v1109_v49 }
  0x6f   : > { %732 = vmatmul.mubr.bf16.vlgmr.msra.gmra.mrb[0].mxu0 %v937_v50  ;;  %773 = vmatmul.mubr.bf16.vlgmr.msra.gmra.mrb[0].mxu1 %v937_v50 }
 0x142   : > { %v733_v51 = vpop.f32.mrb[0].mxu0  ;;  %v774_v52 = vpop.f32.mrb[0].mxu1 }
 0x143   : > { %781 = vst [vmem:[%s341_s13] sm:$0xff] %v733_v51  ;;  %v792_v53 = vmul.f32 %v733_v51, %v733_v51  ;;  %v735_v54 = vpop.f32.mrb[1].mxu0  ;;  %v776_v55 = vpop.f32.mrb[1].mxu1  ;;  %v794_v57 = vmul.f32 %v774_v52, %v774_v52  ;;  %783 = vst [vmem:[%s341_s13 + $0x10] sm:$0xff] %v774_v52 }
 0x144   : > { %782 = vst [vmem:[%s341_s13 + $0x8] sm:$0xff] %v735_v54  ;;  %v785_v56 = vadd.f32 %v735_v54, %v733_v51  ;;  %v793_v58 = vmul.f32 %v735_v54, %v735_v54  ;;  %v737_v59 = vpop.f32.mrb[2].mxu0  ;;  %v778_v60 = vpop.f32.mrb[2].mxu1  ;;  %784 = vst [vmem:[%s341_s13 + $0x18] sm:$0xff] %v776_v55  ;;  %v795_v2 = vmul.f32 %v776_v55, %v776_v55 }
 0x145   : > { %v738_v61 = vpop.f32.mrb[3].mxu0  ;;  %v779_v62 = vpop.f32.mrb[3].mxu1 }
 0x146   : > { %v786_v63 = vadd.f32 %v785_v56, %v774_v52  ;;  %v796_v0 = vadd.f32 %v793_v58, %v792_v53 }
 0x148   : > { %v787_v1 = vadd.f32 %v786_v63, %v776_v55  ;;  %v797_v3 = vadd.f32 %v796_v0, %v794_v57 }
 0x14a   : > { %788 = vadd.xlane.f32.xlu0 %v787_v1  ;;  %v798_v4 = vadd.f32 %v797_v3, %v795_v2 }
 0x14e   : > { %799 = vadd.xlane.f32.xlu0 %v798_v4 }
 0x1d7   : > { %v789_v5 = vpop.xlane.xlu0 %788 }
 0x1d8   : > { %791 = vst.msk [vmem:[%s346_s20] sm:$0xff] %vm790_vm1, %v789_v5 }
 0x1db   : > { %v800_v6 = vpop.xlane.xlu0 %799 }
 0x1dc   : > { %801 = vst.msk [vmem:[%s350_s24] sm:$0xff] %vm790_vm1, %v800_v6 }
 0x1dd PF: > { %p12_p10 = scmp.ge.s32.totalorder %s1180_s19, 4   ;;  %s1410_s15 = smov %s1130_s16 }
 0x1de   : > { %s1411_s16 = smov %s1189_s22  ;;  %s1412_s17 = smov %s1180_s19 }
 0x1df   :  { %14 = sbr.rel (!%p12_p10) target bundleno = 2 (0x2), region = 110 }

// kernel: residual_block_3d.5
= control target key start
LH: loop header
LB: loop body
LE: loop exit
PB: predicated region body
PF: predicated region fallthrough
CT: control target
= control target key end

     0   :  { %s330_s12 = smov 0   ;;  %s353_s0 = inlined_call_operand.vmem [shape: f32[8,1024], index: 0, kind: input, shape index: {}]   ;;  %s354_s1 = inlined_call_operand.vmem [shape: f32[8,1], index: 1, kind: input, shape index: {}]   ;;  %s355_s2 = inlined_call_operand.vmem [shape: f32[8,1], index: 2, kind: input, shape index: {}]   ;;  %s356_s3 = inlined_call_operand.vmem [shape: bf16[8,1024], index: 3, kind: output, shape index: {}]  }
   0x1 LB: > { %s276_s13 = sadd.s32 4294967295, %s307_s12   ;;  %p280_p0 = scmp.ge.s32.totalorder %s307_s12, 1  ;;  %s307_s12 = sphi %s330_s12, %s13_s12  }
   0x2   : > { %p138_p1 = scmp.lt.s32.totalorder %s307_s12, 3 }
   0x4   : > { %p139_p2 = pnand %p280_p0, %p138_p1 }
   0x5   : > { %v178_v0 = vld [vmem:[%s354_s1] sm:$0xff] (!%p139_p2)  ;;  %v309_v1 = vmov (!%p139_p2), 0   ;;  %s281_s18 = sshll.u32 (!%p139_p2), %s276_s13, 2 }
   0x6   : > { %142 = sbr.rel (%p139_p2) target bundleno = 146 (0x92), region = 32  ;;  %300 = vset.pattern.permute.xlu0 (!%p139_p2), %v309_v1  ;;  %v188_v2 = vld [vmem:[%s355_s2] sm:$0xff] (!%p139_p2)  ;;  %p163_p3 = scmp.lt.s32.totalorder (!%p139_p2), %s281_s18, 7 }
   0x7   : > { %181 = vperm.xlu0 (!%p139_p2), %300, %v178_v0  }
   0xb   : > { %191 = vperm.xlu0 (!%p139_p2), %300, %v188_v2  }
   0xd   : > { %s358_s18 = smov (!%p163_p3, %s281_s18), 7 }
   0xe   : > { %s282_s19 = sshll.u32 %s358_s18, 3  ;;  %s284_s23 = sshll.u32 %s358_s18, 2 }
   0xf   : > { %s166_s22 = scalar_lea.vmem %s353_s0, %s282_s19  ;;  %s172_s26 = scalar_lea.vmem %s356_s3, %s284_s23 }
  0x10   : > { %v174_v3 = vld [vmem:[%s166_s22] sm:$0xff]  ;;  %v175_v5 = vld [vmem:[%s166_s22 + $0x8] sm:$0xff]  ;;  %v176_v6 = vld [vmem:[%s166_s22 + $0x10] sm:$0xff] }
  0x11   : > { %v177_v7 = vld [vmem:[%s166_s22 + $0x18] sm:$0xff] }
  0x86   : > { %v182_v4 = vpop.permute.xlu0 %181 }
  0x87   : > { %v184_v8 = vmul.f32 %v182_v4, %v174_v3  ;;  %v185_v9 = vmul.f32 %v182_v4, %v175_v5  ;;  %v186_v10 = vmul.f32 %v182_v4, %v176_v6  ;;  %v187_v11 = vmul.f32 %v182_v4, %v177_v7 }
  0x8a   : > { %v192_v12 = vpop.permute.xlu0 %191 }
  0x8b   : > { %v194_v13 = vadd.f32 %v192_v12, %v184_v8  ;;  %v195_v14 = vadd.f32 %v192_v12, %v185_v9  ;;  %v196_v15 = vadd.f32 %v192_v12, %v186_v10  ;;  %v197_v16 = vadd.f32 %v192_v12, %v187_v11 }
  0x8d   : > { %v198_v17 = vmax.f32 %v194_v13, 0.0  ;;  %v199_v18 = vmax.f32 %v195_v14, 0.0  ;;  %v200_v19 = vmax.f32 %v196_v15, 0.0  ;;  %v201_v20 = vmax.f32 %v197_v16, 0.0 }
  0x8f   : > { %v289_v21 = vpack.c.bf16 %v199_v18, %v198_v17  ;;  %v290_v22 = vpack.c.bf16 %v201_v20, %v200_v19 }
  0x91   : > { %218 = vst [vmem:[%s172_s26] sm:$0xff] %v289_v21  ;;  %219 = vst [vmem:[%s172_s26 + $0x8] sm:$0xff] %v290_v22 }
  0x92 PF: > { %s13_s12 = sadd.s32 1, %s307_s12  }
  0x93   : > { %p10_p4 = scmp.ge.s32.totalorder %s13_s12, 4  }
  0x95   :  { %12 = sbr.rel (!%p10_p4) target bundleno = 1 (0x1), region = 62 }

// kernel: residual_block_3d.7
= control target key start
LH: loop header
LB: loop body
LE: loop exit
PB: predicated region body
PF: predicated region fallthrough
CT: control target
= control target key end

     0   :  { %s388_s15 = smov 0   ;;  %s414_s0 = inlined_call_operand.vmem [shape: f32[8,1024], index: 0, kind: input, shape index: {}]   ;;  %s415_s1 = inlined_call_operand.vmem [shape: f32[8,1], index: 1, kind: input, shape index: {}]   ;;  %s416_s2 = inlined_call_operand.vmem [shape: f32[8,1], index: 2, kind: input, shape index: {}]   ;;  %s417_s3 = inlined_call_operand.vmem [shape: f32[8,1024], index: 3, kind: input, shape index: {}]   ;;  %s418_s4 = inlined_call_operand.vmem [shape: f32[8,1024], index: 4, kind: output, shape index: {}]  }
   0x1 LB: > { %s331_s16 = sadd.s32 4294967295, %s360_s15   ;;  %p335_p0 = scmp.ge.s32.totalorder %s360_s15, 1  ;;  %s360_s15 = sphi %s388_s15, %s14_s15  }
   0x2   : > { %p174_p1 = scmp.lt.s32.totalorder %s360_s15, 3 }
   0x4   : > { %p175_p2 = pnand %p335_p0, %p174_p1 }
   0x5   : > { %v227_v0 = vld [vmem:[%s415_s1] sm:$0xff] (!%p175_p2)  ;;  %v362_v1 = vmov (!%p175_p2), 0   ;;  %s336_s21 = sshll.u32 (!%p175_p2), %s331_s16, 2 }
   0x6   : > { %178 = sbr.rel (%p175_p2) target bundleno = 147 (0x93), region = 36  ;;  %353 = vset.pattern.permute.xlu0 (!%p175_p2), %v362_v1  ;;  %v237_v2 = vld [vmem:[%s416_s2] sm:$0xff] (!%p175_p2)  ;;  %p206_p3 = scmp.lt.s32.totalorder (!%p175_p2), %s336_s21, 7 }
   0x7   : > { %230 = vperm.xlu0 (!%p175_p2), %353, %v227_v0  }
   0xb   : > { %240 = vperm.xlu0 (!%p175_p2), %353, %v237_v2  }
   0xd   : > { %s420_s21 = smov (!%p206_p3, %s336_s21), 7 }
   0xe   : > { %s337_s22 = sshll.u32 %s420_s21, 3 }
   0xf   : > { %s209_s25 = scalar_lea.vmem %s414_s0, %s337_s22  ;;  %s215_s28 = scalar_lea.vmem %s417_s3, %s337_s22 }
  0x10   : > { %v223_v3 = vld [vmem:[%s209_s25] sm:$0xff]  ;;  %v224_v5 = vld [vmem:[%s209_s25 + $0x8] sm:$0xff]  ;;  %v225_v6 = vld [vmem:[%s209_s25 + $0x10] sm:$0xff]  ;;  %s221_s5 = scalar_lea.vmem %s418_s4, %s337_s22 }
  0x11   : > { %v226_v7 = vld [vmem:[%s209_s25 + $0x18] sm:$0xff]  ;;  %v247_v13 = vld [vmem:[%s215_s28] sm:$0xff]  ;;  %v248_v14 = vld [vmem:[%s215_s28 + $0x8] sm:$0xff] }
  0x12   : > { %v249_v15 = vld [vmem:[%s215_s28 + $0x10] sm:$0xff]  ;;  %v250_v20 = vld [vmem:[%s215_s28 + $0x18] sm:$0xff] }
  0x86   : > { %v231_v4 = vpop.permute.xlu0 %230 }
  0x87   : > { %v233_v8 = vmul.f32 %v231_v4, %v223_v3  ;;  %v234_v9 = vmul.f32 %v231_v4, %v224_v5  ;;  %v235_v10 = vmul.f32 %v231_v4, %v225_v6  ;;  %v236_v11 = vmul.f32 %v231_v4, %v226_v7 }
  0x8a   : > { %v241_v12 = vpop.permute.xlu0 %240 }
  0x8b   : > { %v243_v16 = vadd.f32 %v241_v12, %v233_v8  ;;  %v244_v17 = vadd.f32 %v241_v12, %v234_v9  ;;  %v245_v18 = vadd.f32 %v241_v12, %v235_v10  ;;  %v246_v19 = vadd.f32 %v241_v12, %v236_v11 }
  0x8d   : > { %v251_v21 = vadd.f32 %v247_v13, %v243_v16  ;;  %v252_v22 = vadd.f32 %v248_v14, %v244_v17  ;;  %v253_v23 = vadd.f32 %v249_v15, %v245_v18  ;;  %v254_v24 = vadd.f32 %v250_v20, %v246_v19 }
  0x8f   : > { %v255_v25 = vmax.f32 %v251_v21, 0.0  ;;  %v256_v26 = vmax.f32 %v252_v22, 0.0  ;;  %v257_v27 = vmax.f32 %v253_v23, 0.0  ;;  %v258_v28 = vmax.f32 %v254_v24, 0.0 }
  0x91   : > { %259 = vst [vmem:[%s221_s5] sm:$0xff] %v255_v25  ;;  %260 = vst [vmem:[%s221_s5 + $0x8] sm:$0xff] %v256_v26 }
  0x92   : > { %261 = vst [vmem:[%s221_s5 + $0x10] sm:$0xff] %v257_v27  ;;  %262 = vst [vmem:[%s221_s5 + $0x18] sm:$0xff] %v258_v28 }
  0x93 PF: > { %s14_s15 = sadd.s32 1, %s360_s15  }
  0x94   : > { %p11_p4 = scmp.ge.s32.totalorder %s14_s15, 4  }
  0x96   :  { %13 = sbr.rel (!%p11_p4) target bundleno = 1 (0x1), region = 69 }

</bundles_post_ra>
